<compile_context>
chip_gen: v6e
topology: v6e:2x2x1
jax: 0.10.0
libtpu: 0.0.40
codegen_flags: <defaults>
</compile_context>

<pallas_src>
import functools

import jax
import jax.numpy as jnp
from jax.experimental import pallas as pl
from jax.experimental.pallas import tpu as pltpu


def _round_up(x, m):
    return (x + m - 1) // m * m


def vcnet_kernel(
    # per-tile input: [x | target] packed, bf16
    xt_ref,
    # resident weights (bf16 matmul operands, f32 biases; BN folded, heads fused)
    we1_ref, be1_ref,            # encoder L1 (extra zero row for target lane)
    we2_ref, be2_ref,            # encoder L2
    wz_ref, bz_ref, wt_ref,      # merged [pred-L1(BN folded) | dec-L1 z-rows], target row
    wh_ref, bh_ref,              # fused head: [pred head | dec head] -> packed slab
    # true-width packed output: [pred | x_cf]
    out_ref,
    *, input_dim, pred_out,
):
    f32 = jnp.float32
    bf16 = jnp.bfloat16

    xt = xt_ref[...]                                   # (TB, input_dim+1) bf16

    # ----- encoder -----
    h = jnp.dot(xt, we1_ref[...], preferred_element_type=f32) + be1_ref[...]
    h = jnp.maximum(h, 0.0)
    z = jnp.dot(h.astype(bf16), we2_ref[...], preferred_element_type=f32) + be2_ref[...]
    z = jnp.maximum(z, 0.0)

    # ----- single matmul feeds both heads -----
    # columns [0:pred_hid]  = BN-folded predictor layer-1
    # columns [pred_hid: ]  = z-rows of decoder layer-1
    zc = jnp.dot(z.astype(bf16), wz_ref[...], preferred_element_type=f32) + bz_ref[...]
    # target contribution (wt is zero on the predictor columns)
    t = xt[:, input_dim:input_dim + 1].astype(f32)     # (TB, 1)
    a = jnp.maximum(zc + t * wt_ref[...], 0.0)

    # ----- fused head matmul -> packed [pred_logits | x_cf] -----
    # (Dropout(p=0.3) is identity in eval mode.)
    slab = jnp.dot(a.astype(bf16), wh_ref[...], preferred_element_type=f32) + bh_ref[...]

    # numerically stable sigmoid on the first pred_out lanes only (EUP exp + recip)
    neg = slab < 0.0
    e = jnp.exp(jnp.where(neg, slab, -slab))
    r = pl.reciprocal(1.0 + e, approx=False)
    sig = jnp.where(neg, e * r, r)
    lane = jax.lax.broadcasted_iota(jnp.int32, slab.shape, 1)
    out_ref[...] = jnp.where(lane < pred_out, sig, slab)


@functools.partial(jax.jit, static_argnames=("batch_tile",))
def vcnet_forward(params, x, target_class, *, batch_tile=2048):
    f32 = jnp.float32
    bf16 = jnp.bfloat16
    x = x.astype(f32)
    B, input_dim = x.shape
    t = target_class.reshape(-1, 1).astype(f32)        # .view(-1,1).expand(-1,1)

    # ---- fold eval-mode BatchNorm into predictor layer-1 ----
    inv = params["bn_gamma"] * jax.lax.rsqrt(params["bn_var"] + 1e-5)
    wp1_f = params["wp1"] * inv
    bp1_f = (params["bp1"] - params["bn_mean"]) * inv + params["bn_beta"]

    # ---- split decoder layer-1 into z-rows / target-row ----
    enc_hid = params["we1"].shape[1]
    enc_out = params["we2"].shape[1]
    wd1, bd1 = params["wd1"], params["bd1"]
    assert wd1.shape[0] == enc_out + 1, (
        "decoder input dim must equal encoder_out_dim + 1 (concat([z, target]))")
    wd1z, wd1t = wd1[:enc_out], wd1[enc_out:]          # (enc_out, dec_hid), (1, dec_hid)

    pred_hid = wp1_f.shape[1]
    dec_hid = wd1z.shape[1]
    width = pred_hid + dec_hid

    # ---- merge the two z-consuming matmuls ----
    wz = jnp.concatenate([wp1_f, wd1z], axis=1).astype(bf16)        # (enc_out, width)
    bz = jnp.concatenate([bp1_f, bd1], axis=1).astype(f32)          # (1, width)
    wt = jnp.concatenate([jnp.zeros((1, pred_hid), f32), wd1t], axis=1)  # (1, width)

    # ---- fuse the two heads into one matmul producing the packed output ----
    wp2, bp2 = params["wp2"], params["bp2"]
    wd2, bd2 = params["wd2"], params["bd2"]
    pred_out = wp2.shape[1]
    out_w = pred_out + input_dim
    wp2_pad = jnp.concatenate([wp2, jnp.zeros((dec_hid, pred_out), f32)], axis=0)
    wd2_pad = jnp.concatenate([jnp.zeros((pred_hid, input_dim), f32), wd2], axis=0)
    wh = jnp.concatenate([wp2_pad, wd2_pad], axis=1).astype(bf16)   # (width, out_w)
    bh = jnp.concatenate([bp2, bd2], axis=1).astype(f32)            # (1, out_w)

    # ---- encoder weights (extra zero row so the target lane is ignored) ----
    we1_ext = jnp.concatenate(
        [params["we1"], jnp.zeros((1, enc_hid), f32)], axis=0).astype(bf16)
    be1 = params["be1"].astype(f32)
    we2 = params["we2"].astype(bf16)
    be2 = params["be2"].astype(f32)

    # ---- fold target into the x slab (one bf16 input stream) ----
    xt = jnp.concatenate([x, t], axis=1).astype(bf16)   # (B, input_dim+1)

    # ---- batch tiling: TB multiple of 16 (bf16 sublane pack), >=2 grid steps
    #      for large B so the "parallel" axis shards across v7x's two TCs ----
    half = max(16, _round_up((B + 1) // 2, 16))
    TB = min(_round_up(batch_tile, 16), half)
    B_pad = _round_up(B, TB)
    if B_pad != B:
        xt = jnp.pad(xt, ((0, B_pad - B), (0, 0)))

    weights = (we1_ext, be1, we2, be2, wz, bz, wt, wh, bh)

    tile_map = lambda i: (i, 0)
    const_map = lambda i: (0, 0)                        # weights resident across steps
    in_specs = ([pl.BlockSpec((TB, input_dim + 1), tile_map)]
                + [pl.BlockSpec(w.shape, const_map) for w in weights])
    out_specs = pl.BlockSpec((TB, out_w), tile_map)     # full last dim -> one DMA

    flops = 2 * B_pad * ((input_dim + 1) * enc_hid + enc_hid * enc_out
                         + enc_out * width + width * out_w)
    bytes_accessed = (2 * B_pad * (input_dim + 1)
                      + sum(int(w.size) * w.dtype.itemsize for w in weights)
                      + 4 * B_pad * out_w)
    cost = pl.CostEstimate(flops=int(flops),
                           transcendentals=int(B_pad * out_w),
                           bytes_accessed=int(bytes_accessed))

    # explicit VMEM limit with headroom (v7x scoped default is 32 MiB / 64 MiB phys)
    weight_bytes = sum(int(w.size) * w.dtype.itemsize for w in weights)
    io_bytes = 2 * TB * (input_dim + 1) * 2 + 2 * TB * out_w * 4      # double-buffered
    inter_bytes = TB * (enc_hid + enc_out + 2 * width + out_w) * 6    # f32 + bf16 copies
    vmem_limit = int(min(max(2 * (2 * weight_bytes + io_bytes + inter_bytes),
                             32 * 1024 * 1024), 48 * 1024 * 1024))

    kernel = functools.partial(vcnet_kernel, input_dim=input_dim, pred_out=pred_out)
    slab = pl.pallas_call(
        kernel,
        out_shape=jax.ShapeDtypeStruct((B_pad, out_w), f32),
        grid=(B_pad // TB,),
        in_specs=in_specs,
        out_specs=out_specs,
        compiler_params=pltpu.CompilerParams(
            dimension_semantics=("parallel",),
            vmem_limit_bytes=vmem_limit),
        cost_estimate=cost,
    )(xt, *weights)

    pred = slab[:B, :pred_out]
    x_cf = slab[:B, pred_out:pred_out + input_dim]
    return pred, x_cf


def vcnet_reference(params, x, target_class):
    """Pure-JAX reference with the original (unfused) structure."""
    relu = lambda v: jnp.maximum(v, 0.0)
    h = relu(x @ params["we1"] + params["be1"])
    z = relu(h @ params["we2"] + params["be2"])
    p = z @ params["wp1"] + params["bp1"]
    p = ((p - params["bn_mean"]) * jax.lax.rsqrt(params["bn_var"] + 1e-5)
         * params["bn_gamma"] + params["bn_beta"])
    p = relu(p)
    logits = p @ params["wp2"] + params["bp2"]
    pred = jax.nn.sigmoid(logits)
    z_cf = jnp.concatenate([z, target_class.reshape(-1, 1).astype(jnp.float32)], axis=1)
    d = relu(z_cf @ params["wd1"] + params["bd1"])
    x_cf = d @ params["wd2"] + params["bd2"]
    return pred, x_cf


def init_params(key, input_dim, enc_hid, enc_out, pred_hid, pred_out, dec_hid):
    """Deterministic synthetic parameters (weights stored [in, out])."""
    ks = jax.random.split(key, 10)

    def lin(k, fan_in, fan_out):
        kw, kb = jax.random.split(k)
        bound = 1.0 / jnp.sqrt(fan_in)
        w = jax.random.uniform(kw, (fan_in, fan_out), jnp.float32, -bound, bound)
        b = jax.random.uniform(kb, (1, fan_out), jnp.float32, -bound, bound)
        return w, b

    we1, be1 = lin(ks[0], input_dim, enc_hid)
    we2, be2 = lin(ks[1], enc_hid, enc_out)
    wp1, bp1 = lin(ks[2], enc_out, pred_hid)
    wp2, bp2 = lin(ks[3], pred_hid, pred_out)
    dec_in = dec_hid + pred_out                       # decoder_hid_dim + pred_out_dim
    wd1, bd1 = lin(ks[4], dec_in, dec_hid)
    wd2, bd2 = lin(ks[5], dec_hid, input_dim)

    # non-trivial BN running stats so the host-side fold is actually exercised
    bn_gamma = 1.0 + 0.1 * jax.random.normal(ks[6], (1, pred_hid), jnp.float32)
    bn_beta = 0.1 * jax.random.normal(ks[7], (1, pred_hid), jnp.float32)
    bn_mean = 0.05 * jax.random.normal(ks[8], (1, pred_hid), jnp.float32)
    bn_var = jnp.abs(1.0 + 0.1 * jax.random.normal(ks[9], (1, pred_hid), jnp.float32))

    return {
        "we1": we1, "be1": be1, "we2": we2, "be2": be2,
        "wp1": wp1, "bp1": bp1, "wp2": wp2, "bp2": bp2,
        "bn_gamma": bn_gamma, "bn_beta": bn_beta,
        "bn_mean": bn_mean, "bn_var": bn_var,
        "wd1": wd1, "bd1": bd1, "wd2": wd2, "bd2": bd2,
    }


if __name__ == "__main__":
    # Dims must satisfy decoder_hid + pred_out == encoder_out + 1 so that the
    # decoder input matches concat([z, target]) (same constraint as the PyTorch
    # module), hence pred_out=1 and dec_hid = enc_out.
    B = 8
    input_dim = 16
    enc_hid = 32
    enc_out = 32
    pred_hid = 32
    pred_out = 1
    dec_hid = enc_out  # 32

    key = jax.random.PRNGKey(0)
    kp, kx, kt = jax.random.split(key, 3)
    params = init_params(kp, input_dim, enc_hid, enc_out, pred_hid, pred_out, dec_hid)

    x = jax.random.normal(kx, (B, input_dim), jnp.float32)
    target_class = jax.random.bernoulli(kt, 0.5, (B,)).astype(jnp.float32)

    pred, x_cf = vcnet_forward(params, x, target_class)
    jax.block_until_ready((pred, x_cf))

    pred_ref, xcf_ref = vcnet_reference(params, x, target_class)

    assert pred.shape == (B, pred_out)
    assert x_cf.shape == (B, input_dim)
    assert bool(jnp.all(jnp.isfinite(pred))) and bool(jnp.all(jnp.isfinite(x_cf)))
    assert bool(jnp.allclose(pred, pred_ref, atol=2e-2, rtol=2e-2))
    assert bool(jnp.allclose(x_cf, xcf_ref, atol=2e-2, rtol=2e-2))

    print("KERNEL_OK")
</pallas_src>

<mosaic_0001>
module attributes {stable_mosaic.version = 11 : i64} {
  func.func @vcnet_kernel(%arg0: i32, %arg1: memref<16x17xbf16, #tpu.memory_space<vmem>>, %arg2: memref<17x32xbf16, #tpu.memory_space<vmem>>, %arg3: memref<1x32xf32, #tpu.memory_space<vmem>>, %arg4: memref<32x32xbf16, #tpu.memory_space<vmem>>, %arg5: memref<1x32xf32, #tpu.memory_space<vmem>>, %arg6: memref<32x64xbf16, #tpu.memory_space<vmem>>, %arg7: memref<1x64xf32, #tpu.memory_space<vmem>>, %arg8: memref<1x64xf32, #tpu.memory_space<vmem>>, %arg9: memref<64x17xbf16, #tpu.memory_space<vmem>>, %arg10: memref<1x17xf32, #tpu.memory_space<vmem>>, %arg11: memref<16x17xf32, #tpu.memory_space<vmem>>) attributes {dimension_semantics = [#tpu.dimension_semantics<parallel>], iteration_bounds = array<i64: 1>, scalar_prefetch = 0 : i64, scratch_operands = 0 : i64, tpu.core_type = #tpu.core_type<tc>, window_params = [{transform_indices = @transform_0, window_bounds = array<i64: 16, 17>}, {pipeline_mode = #tpu.pipeline_mode<synchronous>, transform_indices = @transform_1, window_bounds = array<i64: 17, 32>}, {pipeline_mode = #tpu.pipeline_mode<synchronous>, transform_indices = @transform_2, window_bounds = array<i64: 1, 32>}, {pipeline_mode = #tpu.pipeline_mode<synchronous>, transform_indices = @transform_3, window_bounds = array<i64: 32, 32>}, {pipeline_mode = #tpu.pipeline_mode<synchronous>, transform_indices = @transform_4, window_bounds = array<i64: 1, 32>}, {pipeline_mode = #tpu.pipeline_mode<synchronous>, transform_indices = @transform_5, window_bounds = array<i64: 32, 64>}, {pipeline_mode = #tpu.pipeline_mode<synchronous>, transform_indices = @transform_6, window_bounds = array<i64: 1, 64>}, {pipeline_mode = #tpu.pipeline_mode<synchronous>, transform_indices = @transform_7, window_bounds = array<i64: 1, 64>}, {pipeline_mode = #tpu.pipeline_mode<synchronous>, transform_indices = @transform_8, window_bounds = array<i64: 64, 17>}, {pipeline_mode = #tpu.pipeline_mode<synchronous>, transform_indices = @transform_9, window_bounds = array<i64: 1, 17>}, {transform_indices = @transform_10, window_bounds = array<i64: 16, 17>}]} {
    %c0 = arith.constant 0 : index
    %c0_0 = arith.constant 0 : index
    %0 = vector.load %arg1[%c0, %c0_0] : memref<16x17xbf16, #tpu.memory_space<vmem>>, vector<16x17xbf16>
    %c0_1 = arith.constant 0 : index
    %c0_2 = arith.constant 0 : index
    %1 = vector.load %arg2[%c0_1, %c0_2] : memref<17x32xbf16, #tpu.memory_space<vmem>>, vector<17x32xbf16>
    %cst = arith.constant dense<0.000000e+00> : vector<16x32xf32>
    %2 = tpu.matmul %0, %1, %cst {dimension_numbers = #tpu.dot_dimension_numbers<[1], [0], [0], [1], [0, 0, 1, 1], [], []>} : vector<16x17xbf16>, vector<17x32xbf16>, vector<16x32xf32> -> vector<16x32xf32>
    %c0_3 = arith.constant 0 : index
    %c0_4 = arith.constant 0 : index
    %3 = vector.load %arg3[%c0_3, %c0_4] : memref<1x32xf32, #tpu.memory_space<vmem>>, vector<1x32xf32>
    %4 = vector.broadcast %3 : vector<1x32xf32> to vector<16x32xf32>
    %5 = arith.addf %2, %4 : vector<16x32xf32>
    %cst_5 = arith.constant 0.000000e+00 : f32
    %6 = vector.broadcast %cst_5 : f32 to vector<16x32xf32>
    %7 = arith.maximumf %5, %6 : vector<16x32xf32>
    %8 = arith.truncf %7 : vector<16x32xf32> to vector<16x32xbf16>
    %c0_6 = arith.constant 0 : index
    %c0_7 = arith.constant 0 : index
    %9 = vector.load %arg4[%c0_6, %c0_7] : memref<32x32xbf16, #tpu.memory_space<vmem>>, vector<32x32xbf16>
    %cst_8 = arith.constant dense<0.000000e+00> : vector<16x32xf32>
    %10 = tpu.matmul %8, %9, %cst_8 {dimension_numbers = #tpu.dot_dimension_numbers<[1], [0], [0], [1], [0, 0, 1, 1], [], []>} : vector<16x32xbf16>, vector<32x32xbf16>, vector<16x32xf32> -> vector<16x32xf32>
    %c0_9 = arith.constant 0 : index
    %c0_10 = arith.constant 0 : index
    %11 = vector.load %arg5[%c0_9, %c0_10] : memref<1x32xf32, #tpu.memory_space<vmem>>, vector<1x32xf32>
    %12 = vector.broadcast %11 : vector<1x32xf32> to vector<16x32xf32>
    %13 = arith.addf %10, %12 : vector<16x32xf32>
    %cst_11 = arith.constant 0.000000e+00 : f32
    %14 = vector.broadcast %cst_11 : f32 to vector<16x32xf32>
    %15 = arith.maximumf %13, %14 : vector<16x32xf32>
    %16 = arith.truncf %15 : vector<16x32xf32> to vector<16x32xbf16>
    %c0_12 = arith.constant 0 : index
    %c0_13 = arith.constant 0 : index
    %17 = vector.load %arg6[%c0_12, %c0_13] : memref<32x64xbf16, #tpu.memory_space<vmem>>, vector<32x64xbf16>
    %cst_14 = arith.constant dense<0.000000e+00> : vector<16x64xf32>
    %18 = tpu.matmul %16, %17, %cst_14 {dimension_numbers = #tpu.dot_dimension_numbers<[1], [0], [0], [1], [0, 0, 1, 1], [], []>} : vector<16x32xbf16>, vector<32x64xbf16>, vector<16x64xf32> -> vector<16x64xf32>
    %c0_15 = arith.constant 0 : index
    %c0_16 = arith.constant 0 : index
    %19 = vector.load %arg7[%c0_15, %c0_16] : memref<1x64xf32, #tpu.memory_space<vmem>>, vector<1x64xf32>
    %20 = vector.broadcast %19 : vector<1x64xf32> to vector<16x64xf32>
    %21 = arith.addf %18, %20 : vector<16x64xf32>
    %22 = vector.extract_strided_slice %0 {offsets = [0, 16], sizes = [16, 1], strides = [1, 1]} : vector<16x17xbf16> to vector<16x1xbf16>
    %23 = arith.extf %22 : vector<16x1xbf16> to vector<16x1xf32>
    %c0_17 = arith.constant 0 : index
    %c0_18 = arith.constant 0 : index
    %24 = vector.load %arg8[%c0_17, %c0_18] : memref<1x64xf32, #tpu.memory_space<vmem>>, vector<1x64xf32>
    %25 = vector.broadcast %23 : vector<16x1xf32> to vector<16x64xf32>
    %26 = vector.broadcast %24 : vector<1x64xf32> to vector<16x64xf32>
    %27 = arith.mulf %25, %26 : vector<16x64xf32>
    %28 = arith.addf %21, %27 : vector<16x64xf32>
    %cst_19 = arith.constant 0.000000e+00 : f32
    %29 = vector.broadcast %cst_19 : f32 to vector<16x64xf32>
    %30 = arith.maximumf %28, %29 : vector<16x64xf32>
    %31 = arith.truncf %30 : vector<16x64xf32> to vector<16x64xbf16>
    %c0_20 = arith.constant 0 : index
    %c0_21 = arith.constant 0 : index
    %32 = vector.load %arg9[%c0_20, %c0_21] : memref<64x17xbf16, #tpu.memory_space<vmem>>, vector<64x17xbf16>
    %cst_22 = arith.constant dense<0.000000e+00> : vector<16x17xf32>
    %33 = tpu.matmul %31, %32, %cst_22 {dimension_numbers = #tpu.dot_dimension_numbers<[1], [0], [0], [1], [0, 0, 1, 1], [], []>} : vector<16x64xbf16>, vector<64x17xbf16>, vector<16x17xf32> -> vector<16x17xf32>
    %c0_23 = arith.constant 0 : index
    %c0_24 = arith.constant 0 : index
    %34 = vector.load %arg10[%c0_23, %c0_24] : memref<1x17xf32, #tpu.memory_space<vmem>>, vector<1x17xf32>
    %35 = vector.broadcast %34 : vector<1x17xf32> to vector<16x17xf32>
    %36 = arith.addf %33, %35 : vector<16x17xf32>
    %cst_25 = arith.constant 0.000000e+00 : f32
    %37 = vector.broadcast %cst_25 : f32 to vector<16x17xf32>
    %38 = arith.cmpf olt, %36, %37 : vector<16x17xf32>
    %cst_26 = arith.constant 0.000000e+00 : f32
    %39 = vector.broadcast %cst_26 : f32 to vector<16x17xf32>
    %40 = arith.subf %39, %36 : vector<16x17xf32>
    %41 = arith.select %38, %36, %40 : vector<16x17xi1>, vector<16x17xf32>
    %42 = math.exp %41 : vector<16x17xf32>
    %cst_27 = arith.constant 1.000000e+00 : f32
    %43 = vector.broadcast %cst_27 : f32 to vector<16x17xf32>
    %44 = arith.addf %43, %42 : vector<16x17xf32>
    %45 = tpu.reciprocal %44 : vector<16x17xf32> -> vector<16x17xf32>
    %46 = arith.mulf %42, %45 : vector<16x17xf32>
    %47 = arith.select %38, %46, %45 : vector<16x17xi1>, vector<16x17xf32>
    %48 = tpu.iota {dimensions = array<i32: 1>} : vector<16x17xi32>
    %c1_i32 = arith.constant 1 : i32
    %49 = vector.broadcast %c1_i32 : i32 to vector<16x17xi32>
    %50 = arith.cmpi slt, %48, %49 : vector<16x17xi32>
    %51 = arith.select %50, %47, %36 : vector<16x17xi1>, vector<16x17xf32>
    %c0_28 = arith.constant 0 : index
    %c0_29 = arith.constant 0 : index
    %52 = vector.load %arg11[%c0_28, %c0_29] : memref<16x17xf32, #tpu.memory_space<vmem>>, vector<16x17xf32>
    tpu.vector_store %arg11[%c0_28, %c0_29], %51 {strides = array<i32>} : memref<16x17xf32, #tpu.memory_space<vmem>>, vector<16x17xf32>,
    return
  }
  func.func @transform_0(%arg0: i32) -> (i32, i32) {
    %c0_i32 = arith.constant 0 : i32
    %c0_i32_0 = arith.constant 0 : i32
    return %arg0, %c0_i32 : i32, i32
  }
  func.func @transform_1(%arg0: i32) -> (i32, i32) {
    %c0_i32 = arith.constant 0 : i32
    %c0_i32_0 = arith.constant 0 : i32
    %c0_i32_1 = arith.constant 0 : i32
    return %c0_i32, %c0_i32_0 : i32, i32
  }
  func.func @transform_2(%arg0: i32) -> (i32, i32) {
    %c0_i32 = arith.constant 0 : i32
    %c0_i32_0 = arith.constant 0 : i32
    %c0_i32_1 = arith.constant 0 : i32
    return %c0_i32, %c0_i32_0 : i32, i32
  }
  func.func @transform_3(%arg0: i32) -> (i32, i32) {
    %c0_i32 = arith.constant 0 : i32
    %c0_i32_0 = arith.constant 0 : i32
    %c0_i32_1 = arith.constant 0 : i32
    return %c0_i32, %c0_i32_0 : i32, i32
  }
  func.func @transform_4(%arg0: i32) -> (i32, i32) {
    %c0_i32 = arith.constant 0 : i32
    %c0_i32_0 = arith.constant 0 : i32
    %c0_i32_1 = arith.constant 0 : i32
    return %c0_i32, %c0_i32_0 : i32, i32
  }
  func.func @transform_5(%arg0: i32) -> (i32, i32) {
    %c0_i32 = arith.constant 0 : i32
    %c0_i32_0 = arith.constant 0 : i32
    %c0_i32_1 = arith.constant 0 : i32
    return %c0_i32, %c0_i32_0 : i32, i32
  }
  func.func @transform_6(%arg0: i32) -> (i32, i32) {
    %c0_i32 = arith.constant 0 : i32
    %c0_i32_0 = arith.constant 0 : i32
    %c0_i32_1 = arith.constant 0 : i32
    return %c0_i32, %c0_i32_0 : i32, i32
  }
  func.func @transform_7(%arg0: i32) -> (i32, i32) {
    %c0_i32 = arith.constant 0 : i32
    %c0_i32_0 = arith.constant 0 : i32
    %c0_i32_1 = arith.constant 0 : i32
    return %c0_i32, %c0_i32_0 : i32, i32
  }
  func.func @transform_8(%arg0: i32) -> (i32, i32) {
    %c0_i32 = arith.constant 0 : i32
    %c0_i32_0 = arith.constant 0 : i32
    %c0_i32_1 = arith.constant 0 : i32
    return %c0_i32, %c0_i32_0 : i32, i32
  }
  func.func @transform_9(%arg0: i32) -> (i32, i32) {
    %c0_i32 = arith.constant 0 : i32
    %c0_i32_0 = arith.constant 0 : i32
    %c0_i32_1 = arith.constant 0 : i32
    return %c0_i32, %c0_i32_0 : i32, i32
  }
  func.func @transform_10(%arg0: i32) -> (i32, i32) {
    %c0_i32 = arith.constant 0 : i32
    %c0_i32_0 = arith.constant 0 : i32
    return %arg0, %c0_i32 : i32, i32
  }
}

</mosaic_0001>

<bundles_post_ra>
// kernel: vcnet_forward.1
= control target key start
LH: loop header
LB: loop body
LE: loop exit
PB: predicated region body
PF: predicated region fallthrough
CT: control target
= control target key end

     0   :  { %vm66_vm0 = vcmask 1040384   ;;  %v493_v0 = vmov 0.0   ;;  %v494_v2 = vmov 0   ;;  %vm495_vm1 = vmmov 0   ;;  %s633_s1 = inlined_call_operand.vmem [shape: bf16[17,32], index: 1, kind: input, shape index: {}]   ;;  %s634_s0 = inlined_call_operand.vmem [shape: bf16[16,17], index: 0, kind: input, shape index: {}]   ;;  %s635_s3 = inlined_call_operand.vmem [shape: bf16[32,32], index: 3, kind: input, shape index: {}]   ;;  %s636_s2 = inlined_call_operand.vmem [shape: f32[1,32], index: 2, kind: input, shape index: {}]   ;;  %s637_s5 = inlined_call_operand.vmem [shape: bf16[32,64], index: 5, kind: input, shape index: {}]   ;;  %s638_s8 = inlined_call_operand.vmem [shape: bf16[64,17], index: 8, kind: input, shape index: {}]   ;;  %s639_s4 = inlined_call_operand.vmem [shape: f32[1,32], index: 4, kind: input, shape index: {}]   ;;  %s640_s7 = inlined_call_operand.vmem [shape: f32[1,64], index: 7, kind: input, shape index: {}]   ;;  %s641_s6 = inlined_call_operand.vmem [shape: f32[1,64], index: 6, kind: input, shape index: {}]   ;;  %s642_s9 = inlined_call_operand.vmem [shape: f32[1,17], index: 9, kind: input, shape index: {}]   ;;  %s643_s10 = inlined_call_operand.vmem [shape: f32[16,17], index: 10, kind: output, shape index: {}]  }
   0x1   :  { %427 = vmatprep.subr.bf16.mxu0 %v493_v0  ;;  %v473_v1 = vld [vmem:[%s633_s1 + $0x8] ss:$0 sps:$4 sm:$0x11]   ;;  %v68_v3 = vsel %vm66_vm0, 65535, %v494_v2  ;;  %431 = vmatprep.mubr.msk.bf16.mxu0 %vm495_vm1, %v493_v0  ;;  %v474_v5 = vld [vmem:[%s633_s1] sm:$0xff]   ;;  %vm62_vm2 = vcmask 138240  }
   0x2   :  { %435 = vmatprep.subr.bf16.mxu1 %v493_v0  ;;  %439 = vmatprep.mubr.msk.bf16.mxu1 %vm495_vm1, %v493_v0  ;;  %v70_v4 = vand.u32 %v473_v1, %v68_v3  ;;  %v36_v6 = vld [vmem:[%s634_s0] sm:$0xff]   ;;  %v476_v7 = vld [vmem:[%s635_s3 + $0x8] sm:$0xff]   ;;  %vm139_vm3 = vcmask 261120   ;;  %v496_v23 = vmov 16   ;;  %v480_v25 = vld [vmem:[%s638_s8 + $0x18] sm:$0xff]   ;;  %vm319_vm4 = vcmask 523264  }
   0x3   :  { %436 = vmatpush3.bf16.msra.mxu1 %v476_v7  ;;  %v477_v8 = vld [vmem:[%s635_s3] sm:$0xff]   ;;  %v478_v19 = vld [vmem:[%s637_s5 + $0x8] sm:$0xff]   ;;  %v254_v21 = vunpack.c.l.bf16 %v36_v6  ;;  %v255_v22 = vunpack.c.h.bf16 %v36_v6  ;;  %467 = vset.pattern.permute.xlu0 %v496_v23  ;;  %v481_v36 = vld [vmem:[%s638_s8 + $0x10] sm:$0xff]  }
   0x4   :  { %428 = vmatpush3.bf16.msra.mxu0 %v70_v4  ;;  %437 = vmatprep.subr.bf16.mxu1 %v493_v0  ;;  %v393_v9 = vld [vmem:[%s636_s2] ss:$0 sm:$0xff]  ;;  %v482_v37 = vld [vmem:[%s638_s8 + $0x8] sm:$0xff]  }
   0x5   :  { %429 = vmatprep.subr.bf16.mxu0 %v493_v0  ;;  %v479_v20 = vld [vmem:[%s637_s5] sm:$0xff]   ;;  %v468_v24 = vpack.i.bf16 %v255_v22, %v254_v21 }
   0x6   :  { %v398_v26 = vld [vmem:[%s639_s4] ss:$0 sm:$0xff] }
   0x7   :  { %438 = vmatpush3.bf16.msra.mxu1 %v477_v8  ;;  %469 = vperm.xlu0 %467, %v468_v24   ;;  %v483_v38 = vld [vmem:[%s638_s8] sm:$0xff]  }
   0x8   :  { %430 = vmatpush3.bf16.msra.mxu0 %v474_v5  ;;  %451 = vmatprep.subr.bf16.mxu1 %v493_v0  ;;  %v406_v41 = vld [vmem:[%s640_s7] ss:$0 sm:$0xff] }
   0x9   :  { %443 = vmatprep.subr.bf16.mxu0 %v493_v0  ;;  %v402_v42 = vld [vmem:[%s641_s6] ss:$0 sm:$0xff] }
   0xa   :  { %v407_v57 = vld [vmem:[%s642_s9] ss:$0 sm:$0xff] }
   0xb   :  { %432 = vmatmul.mubr.msk.bf16.vlgmr.msra.gmra.mxu0 %vm62_vm2, %v36_v6 }
   0xc   :  { %447 = vmatprep.mubr.msk.bf16.mxu0 %vm495_vm1, %v493_v0  ;;  %444 = vmatpush3.bf16.msra.mxu0 %v478_v19 }
   0xd   :  { %445 = vmatprep.subr.bf16.mxu0 %v493_v0 }
  0x10   :  { %446 = vmatpush3.bf16.msra.mxu0 %v479_v20 }
  0x82   :  { %v470_v39 = vpop.permute.xlu0 %469 }
  0x83   :  { %v471_v40 = vunpack.i.l.bf16 %v470_v39  ;;  %v472_v43 = vunpack.i.h.bf16 %v470_v39 }
  0x85   :  { %v273_v45 = vmul.f32 %v471_v40, %v406_v41  ;;  %v274_v48 = vmul.f32 %v472_v43, %v406_v41 }
  0xcb   :  { %v106_v10 = vpop.f32.mrf.mxu0 }
  0xcc   :  { %v107_v12 = vadd.f32 %v393_v9, %v106_v10  ;;  %v382_v10 = vlaneseq }
  0xcd   :  { %v433_v11 = vpop.f32.mrf.mxu0 }
  0xce   :  { %v113_v16 = vmax.f32 %v107_v12, 0.0  ;;  %v383_v11 = vand.u32 127, %v382_v10 }
  0xcf   :  { %v109_v13 = vpop.f32.mrf.mxu0 }
  0xd0   :  { %v110_v14 = vadd.f32 %v393_v9, %v109_v13  ;;  %vm384_vm7 = vcmp.lt.s32.totalorder %v383_v11, 1 }
  0xd1   :  { %v434_v15 = vpop.f32.mrf.mxu0 }
  0xd2   :  { %v114_v17 = vmax.f32 %v110_v14, 0.0 }
  0xd4   :  { %v115_v18 = vpack.c.bf16 %v114_v17, %v113_v16 }
  0xd6   :  { %440 = vmatmul.mubr.msk.bf16.vlgmr.msra.gmra.mxu1 %vm139_vm3, %v115_v18 }
  0xd7   :  { %459 = vmatprep.mubr.msk.bf16.mxu1 %vm495_vm1, %v493_v0  ;;  %452 = vmatpush3.bf16.msra.mxu1 %v480_v25 }
  0xd8   :  { %453 = vmatprep.subr.bf16.mxu1 %v493_v0 }
  0xdb   :  { %454 = vmatpush3.bf16.msra.mxu1 %v481_v36 }
  0xdc   :  { %455 = vmatprep.subr.bf16.mxu1 %v493_v0 }
  0xdf   :  { %456 = vmatpush3.bf16.msra.mxu1 %v482_v37 }
  0xe0   :  { %457 = vmatprep.subr.bf16.mxu1 %v493_v0 }
  0xe3   :  { %458 = vmatpush3.bf16.msra.mxu1 %v483_v38 }
 0x196   :  { %v177_v27 = vpop.f32.mrf.mxu1 }
 0x197   :  { %v178_v29 = vadd.f32 %v398_v26, %v177_v27 }
 0x198   :  { %v441_v28 = vpop.f32.mrf.mxu1 }
 0x199   :  { %v184_v33 = vmax.f32 %v178_v29, 0.0 }
 0x19a   :  { %v180_v30 = vpop.f32.mrf.mxu1 }
 0x19b   :  { %v181_v31 = vadd.f32 %v398_v26, %v180_v30 }
 0x19c   :  { %v442_v32 = vpop.f32.mrf.mxu1 }
 0x19d   :  { %v185_v34 = vmax.f32 %v181_v31, 0.0 }
 0x19f   :  { %v186_v35 = vpack.c.bf16 %v185_v34, %v184_v33 }
 0x1a1   :  { %448 = vmatmul.mubr.msk.bf16.vlgmr.msra.gmra.mxu0 %vm139_vm3, %v186_v35 }
 0x261   :  { %v247_v44 = vpop.f32.mrf.mxu0 }
 0x262   :  { %v248_v46 = vadd.f32 %v402_v42, %v247_v44 }
 0x263   :  { %v449_v47 = vpop.f32.mrf.mxu0 }
 0x264   :  { %v275_v50 = vadd.f32 %v273_v45, %v248_v46 }
 0x265   :  { %v250_v49 = vpop.f32.mrf.mxu0 }
 0x266   :  { %v251_v51 = vadd.f32 %v402_v42, %v250_v49  ;;  %v277_v54 = vmax.f32 %v275_v50, 0.0 }
 0x267   :  { %v450_v52 = vpop.f32.mrf.mxu0 }
 0x268   :  { %v276_v53 = vadd.f32 %v274_v48, %v251_v51 }
 0x26a   :  { %v278_v55 = vmax.f32 %v276_v53, 0.0 }
 0x26c   :  { %v279_v56 = vpack.c.bf16 %v278_v55, %v277_v54 }
 0x26e   :  { %460 = vmatmul.mubr.msk.bf16.vlgmr.msra.gmra.mxu1 %vm319_vm4, %v279_v56 }
 0x32e   :  { %v357_v58 = vpop.f32.mrf.mxu1 }
 0x32f   :  { %v358_v59 = vadd.f32 %v407_v57, %v357_v58 }
 0x330   :  { %v461_v60 = vpop.f32.mrf.mxu1 }
 0x331   :  { %vm364_vm5 = vcmp.lt.f32.partialorder %v358_v59, 0.0  ;;  %v366_v61 = vsub.f32 0.0, %v358_v59 }
 0x332   :  { %v360_v62 = vpop.f32.mrf.mxu1 }
 0x333   :  { %v368_v63 = vsel %vm364_vm5, %v358_v59, %v366_v61  ;;  %v361_v0 = vadd.f32 %v407_v57, %v360_v62 }
 0x334   :  { %v370_v1 = vmul.f32 1.442695, %v368_v63  ;;  %v462_v2 = vpop.f32.mrf.mxu1 }
 0x335   :  { %vm365_vm6 = vcmp.lt.f32.partialorder %v361_v0, 0.0  ;;  %v367_v3 = vsub.f32 0.0, %v361_v0 }
 0x336   :  { %485 = vpow2.f32 %v370_v1 }
 0x337   :  { %v369_v4 = vsel %vm365_vm6, %v361_v0, %v367_v3 }
 0x338   :  { %v372_v5 = vmul.f32 1.442695, %v369_v4 }
 0x33a   :  { %487 = vpow2.f32 %v372_v5 }
 0x343   :  { %v486_v6 = vpop.eup %485 }
 0x344   :  { %v374_v7 = vadd.f32 1.0, %v486_v6 }
 0x346   :  { %489 = vrcp.f32 %v374_v7 }
 0x347   :  { %v488_v8 = vpop.eup %487 }
 0x348   :  { %v375_v9 = vadd.f32 1.0, %v488_v8 }
 0x34a   :  { %491 = vrcp.f32 %v375_v9 }
 0x353   :  { %v490_v12 = vpop.eup %489 }
 0x354   :  { %v378_v13 = vmul.f32 %v490_v12, %v486_v6 }
 0x356   :  { %v380_v14 = vsel %vm364_vm5, %v378_v13, %v490_v12 }
 0x357   :  { %v492_v15 = vpop.eup %491  ;;  %v385_v16 = vsel %vm384_vm7, %v380_v14, %v358_v59 }
 0x358   :  { %387 = vst.msk [vmem:[%s643_s10] sm:$0xff] %vm62_vm2, %v385_v16  ;;  %v379_v17 = vmul.f32 %v492_v15, %v488_v8 }
 0x35a   :  { %v381_v18 = vsel %vm365_vm6, %v379_v17, %v492_v15 }
 0x35b   :  { %v386_v19 = vsel %vm384_vm7, %v381_v18, %v361_v0 }
 0x35c   :  { %388 = vst.msk [vmem:[%s643_s10 + $0x8] sm:$0xff] %vm62_vm2, %v386_v19 }

</bundles_post_ra>
